<compile_context>
chip_gen: v7x
topology: tpu7x:2x2x1
jax: 0.10.0
libtpu: 0.0.40
codegen_flags: <defaults>
</compile_context>

<pallas_src>
import jax
import jax.numpy as jnp
from jax.experimental import pallas as pl
from jax.experimental.pallas import tpu as pltpu

FEATURE_DIM = 16                       # C of feature_volume == in_features of Linear 1
LATENT_DIM = 128
NEG_SLOPE = 0.01                       # nn.LeakyReLU default
N_CORNERS = 8
PACKED_DIM = N_CORNERS * FEATURE_DIM   # 128 lanes: 8 corners x 16 channels
TP = 512                               # points (rows) per grid step


# ----------------------------- Pallas kernel --------------------------------
def _mlp_interp_kernel(x_ref, w1_ref, b1_ref, w2_ref, b2_ref, out_ref):
    # x_ref  : (TP, 128) bf16  -- 8 weight-scaled corner feature groups, lane-dense
    # w1_ref : (128, 128) bf16 -- W1 (16x128) tiled 8x along rows
    # b1_ref : (1, 128)  f32
    # w2_ref : (8, 128)  f32   -- w2 row vector replicated on 8 sublanes
    # b2_ref : (1, 1)    f32   -- scalar in SMEM
    # out_ref: (1, TP)   f32   -- lane-dense per-point outputs

    # Layer 1 fused with the trilinear weighted sum:
    #   x_packed @ [W1; W1; ...; W1]  ==  (sum_k w_k * corner_k) @ W1
    h = jnp.dot(x_ref[...], w1_ref[...], preferred_element_type=jnp.float32)
    h = h + b1_ref[...]
    h = jnp.where(h >= 0, h, NEG_SLOPE * h)                 # LeakyReLU (VPU, f32)

    # Layer 2 (128 -> 1) as a transposed matmul so the result is lane-dense
    # along the point dim (avoids an N=1 matmul + masked (TP,1) stores).
    res = jax.lax.dot_general(
        w2_ref[...], h,
        dimension_numbers=(((1,), (1,)), ((), ())),
        preferred_element_type=jnp.float32)                 # (8, TP), rows identical
    out_ref[...] = res[0:1, :] + b2_ref[0, 0]


# ------------------------------ JAX glue -------------------------------------
def _corner_terms(points, feature_volume):
    """The 8 (weight, corner_feature) trilinear terms (pure JAX: data-dependent gather)."""
    B, C, D, H, W = feature_volume.shape
    x, y, z = points[..., 0], points[..., 1], points[..., 2]
    # align_corners=True mapping from [-1, 1] to voxel coordinates
    ix = (x + 1.0) * 0.5 * (W - 1)
    iy = (y + 1.0) * 0.5 * (H - 1)
    iz = (z + 1.0) * 0.5 * (D - 1)
    x0f, y0f, z0f = jnp.floor(ix), jnp.floor(iy), jnp.floor(iz)
    fx, fy, fz = ix - x0f, iy - y0f, iz - z0f
    x0, y0, z0 = x0f.astype(jnp.int32), y0f.astype(jnp.int32), z0f.astype(jnp.int32)

    fv = jnp.transpose(feature_volume, (0, 2, 3, 4, 1))   # (B, D, H, W, C)
    bidx = jnp.arange(B)[:, None]                         # (B, 1)

    terms = []
    for dz in (0, 1):
        zi = jnp.clip(z0 + dz, 0, D - 1)
        wz = fz if dz else (1.0 - fz)
        for dy in (0, 1):
            yi = jnp.clip(y0 + dy, 0, H - 1)
            wy = fy if dy else (1.0 - fy)
            for dx in (0, 1):
                xi = jnp.clip(x0 + dx, 0, W - 1)
                wx = fx if dx else (1.0 - fx)
                w = (wz * wy * wx)[..., None]              # (B, N, 1)
                terms.append((w, fv[bidx, zi, yi, xi]))    # (B, N, C)
    return terms


def mlp_net_forward(points, feature_volume, params):
    """Returns (B, 1, N), matching MLP_Net.forward's output layout."""
    w1, b1, w2, b2 = params
    B, C, D, H, W = feature_volume.shape
    N = points.shape[1]
    assert C == FEATURE_DIM
    P = B * N

    # Pack the 8 weight-scaled corner features lane-dense: (P, 8*C) = (P, 128).
    terms = _corner_terms(points, feature_volume)
    x = jnp.concatenate([w * c for (w, c) in terms], axis=-1)   # (B, N, 128)
    x = x.reshape(P, PACKED_DIM)

    # Pad the point dim up to whole tiles so every grid step is full/unmasked.
    grid = pl.cdiv(P, TP)
    Pp = grid * TP
    if Pp != P:
        x = jnp.pad(x, ((0, Pp - P), (0, 0)))
    x = x.astype(jnp.bfloat16)            # halve HBM traffic of the dominant stream

    w1_tiled = jnp.tile(w1, (N_CORNERS, 1)).astype(jnp.bfloat16)          # (128, 128)
    b1_row = b1.reshape(1, LATENT_DIM).astype(jnp.float32)                # (1, 128)
    w2_rows = jnp.tile(w2.reshape(1, LATENT_DIM), (8, 1)).astype(jnp.float32)  # (8, 128)
    b2_smem = b2.reshape(1, 1).astype(jnp.float32)                        # (1, 1)

    out = pl.pallas_call(
        _mlp_interp_kernel,
        out_shape=jax.ShapeDtypeStruct((1, Pp), jnp.float32),
        grid=(grid,),
        in_specs=[
            pl.BlockSpec((TP, PACKED_DIM), lambda i: (i, 0)),            # streamed slab
            pl.BlockSpec((LATENT_DIM, LATENT_DIM), lambda i: (0, 0)),    # resident W1
            pl.BlockSpec((1, LATENT_DIM), lambda i: (0, 0)),             # resident b1
            pl.BlockSpec((8, LATENT_DIM), lambda i: (0, 0)),             # resident w2
            pl.BlockSpec(memory_space=pltpu.MemorySpace.SMEM),           # b2 scalar
        ],
        out_specs=pl.BlockSpec((1, TP), lambda i: (0, i)),               # lane-dense out
        compiler_params=pltpu.CompilerParams(
            dimension_semantics=("parallel",),     # shards grid across TCs on v7x
            vmem_limit_bytes=32 * 1024 * 1024),    # explicit VMEM budget (<< limit)
    )(x, w1_tiled, b1_row, w2_rows, b2_smem)

    out = out.reshape(Pp)[:P].reshape(B, N)
    return out[:, None, :]   # (B, 1, N)


def init_params(key):
    """Deterministic PyTorch-style (uniform +-1/sqrt(fan_in)) init."""
    k1, k2, k3, k4 = jax.random.split(key, 4)
    bnd1 = 1.0 / jnp.sqrt(jnp.float32(FEATURE_DIM))
    bnd2 = 1.0 / jnp.sqrt(jnp.float32(LATENT_DIM))
    w1 = jax.random.uniform(k1, (FEATURE_DIM, LATENT_DIM), jnp.float32, -bnd1, bnd1)
    b1 = jax.random.uniform(k2, (1, LATENT_DIM), jnp.float32, -bnd1, bnd1)
    w2 = jax.random.uniform(k3, (LATENT_DIM, 1), jnp.float32, -bnd2, bnd2)
    b2 = jax.random.uniform(k4, (1, 1), jnp.float32, -bnd2, bnd2)
    return w1, b1, w2, b2


def _reference(points, feature_volume, params):
    """Pure-JAX f32 reference of the same forward pass (correctness check)."""
    w1, b1, w2, b2 = params
    B = feature_volume.shape[0]
    N = points.shape[1]
    terms = _corner_terms(points, feature_volume)
    feat = sum(w * c for (w, c) in terms)                      # (B, N, C)
    h = feat.reshape(B * N, FEATURE_DIM) @ w1 + b1
    h = jnp.where(h >= 0, h, NEG_SLOPE * h)
    out = h @ w2 + b2
    return out[:, 0].reshape(B, N)[:, None, :]


if __name__ == "__main__":
    key = jax.random.PRNGKey(0)
    kp, kv, kq = jax.random.split(key, 3)

    B, N = 2, 64
    D = H = W = 8
    params = init_params(kp)
    feature_volume = jax.random.normal(kv, (B, FEATURE_DIM, D, H, W), jnp.float32)
    points = jax.random.uniform(kq, (B, N, 3), jnp.float32, -1.0, 1.0)

    out = jax.jit(mlp_net_forward)(points, feature_volume, params)
    jax.block_until_ready(out)

    ref = _reference(points, feature_volume, params)
    assert out.shape == (B, 1, N), out.shape
    # Layer-1 activations/W1 are bf16 (perf-review request) -> allow a few 1e-2 slack.
    assert jnp.allclose(out, ref, rtol=3e-2, atol=3e-2), "mismatch vs JAX reference"

    print("KERNEL_OK")
</pallas_src>

<mosaic_0001>
module attributes {stable_mosaic.version = 11 : i64} {
  func.func @_mlp_interp_kernel(%arg0: i32, %arg1: memref<512x128xbf16, #tpu.memory_space<vmem>>, %arg2: memref<128x128xbf16, #tpu.memory_space<vmem>>, %arg3: memref<1x128xf32, #tpu.memory_space<vmem>>, %arg4: memref<8x128xf32, #tpu.memory_space<vmem>>, %arg5: memref<1x1xf32, #tpu.memory_space<smem>>, %arg6: memref<1x512xf32, #tpu.memory_space<vmem>>) attributes {dimension_semantics = [#tpu.dimension_semantics<parallel>], iteration_bounds = array<i64: 1>, scalar_prefetch = 0 : i64, scratch_operands = 0 : i64, tpu.core_type = #tpu.core_type<tc>, window_params = [{transform_indices = @transform_0, window_bounds = array<i64: 512, 128>}, {pipeline_mode = #tpu.pipeline_mode<synchronous>, transform_indices = @transform_1, window_bounds = array<i64: 128, 128>}, {pipeline_mode = #tpu.pipeline_mode<synchronous>, transform_indices = @transform_2, window_bounds = array<i64: 1, 128>}, {pipeline_mode = #tpu.pipeline_mode<synchronous>, transform_indices = @transform_3, window_bounds = array<i64: 8, 128>}, {transform_indices = @transform_4, window_bounds = array<i64: 1, 1>}, {transform_indices = @transform_5, window_bounds = array<i64: 1, 512>}]} {
    %c0 = arith.constant 0 : index
    %c0_0 = arith.constant 0 : index
    %0 = vector.load %arg1[%c0, %c0_0] : memref<512x128xbf16, #tpu.memory_space<vmem>>, vector<512x128xbf16>
    %c0_1 = arith.constant 0 : index
    %c0_2 = arith.constant 0 : index
    %1 = vector.load %arg2[%c0_1, %c0_2] : memref<128x128xbf16, #tpu.memory_space<vmem>>, vector<128x128xbf16>
    %cst = arith.constant dense<0.000000e+00> : vector<512x128xf32>
    %2 = tpu.matmul %0, %1, %cst {dimension_numbers = #tpu.dot_dimension_numbers<[1], [0], [0], [1], [0, 0, 1, 1], [], []>} : vector<512x128xbf16>, vector<128x128xbf16>, vector<512x128xf32> -> vector<512x128xf32>
    %c0_3 = arith.constant 0 : index
    %c0_4 = arith.constant 0 : index
    %3 = vector.load %arg3[%c0_3, %c0_4] : memref<1x128xf32, #tpu.memory_space<vmem>>, vector<1x128xf32>
    %4 = vector.broadcast %3 : vector<1x128xf32> to vector<512x128xf32>
    %5 = arith.addf %2, %4 : vector<512x128xf32>
    %cst_5 = arith.constant 0.000000e+00 : f32
    %6 = vector.broadcast %cst_5 : f32 to vector<512x128xf32>
    %7 = arith.cmpf oge, %5, %6 : vector<512x128xf32>
    %cst_6 = arith.constant 0.00999999977 : f32
    %8 = vector.broadcast %cst_6 : f32 to vector<512x128xf32>
    %9 = arith.mulf %8, %5 : vector<512x128xf32>
    %10 = arith.select %7, %5, %9 : vector<512x128xi1>, vector<512x128xf32>
    %c0_7 = arith.constant 0 : index
    %c0_8 = arith.constant 0 : index
    %11 = vector.load %arg4[%c0_7, %c0_8] : memref<8x128xf32, #tpu.memory_space<vmem>>, vector<8x128xf32>
    %cst_9 = arith.constant dense<0.000000e+00> : vector<8x512xf32>
    %12 = tpu.matmul %11, %10, %cst_9 {dimension_numbers = #tpu.dot_dimension_numbers<[1], [1], [0], [0], [0, 0, 1, 0], [], []>} : vector<8x128xf32>, vector<512x128xf32>, vector<8x512xf32> -> vector<8x512xf32>
    %13 = vector.extract_strided_slice %12 {offsets = [0, 0], sizes = [1, 512], strides = [1, 1]} : vector<8x512xf32> to vector<1x512xf32>
    %c0_10 = arith.constant 0 : index
    %c0_11 = arith.constant 0 : index
    %14 = memref.load %arg5[%c0_10, %c0_11] : memref<1x1xf32, #tpu.memory_space<smem>>
    %15 = vector.broadcast %14 : f32 to vector<1x512xf32>
    %16 = arith.addf %13, %15 : vector<1x512xf32>
    %c0_12 = arith.constant 0 : index
    %c0_13 = arith.constant 0 : index
    %17 = vector.load %arg6[%c0_12, %c0_13] : memref<1x512xf32, #tpu.memory_space<vmem>>, vector<1x512xf32>
    tpu.vector_store %arg6[%c0_12, %c0_13], %16 {strides = array<i32>} : memref<1x512xf32, #tpu.memory_space<vmem>>, vector<1x512xf32>,
    return
  }
  func.func @transform_0(%arg0: i32) -> (i32, i32) {
    %c0_i32 = arith.constant 0 : i32
    %c0_i32_0 = arith.constant 0 : i32
    return %arg0, %c0_i32 : i32, i32
  }
  func.func @transform_1(%arg0: i32) -> (i32, i32) {
    %c0_i32 = arith.constant 0 : i32
    %c0_i32_0 = arith.constant 0 : i32
    %c0_i32_1 = arith.constant 0 : i32
    return %c0_i32, %c0_i32_0 : i32, i32
  }
  func.func @transform_2(%arg0: i32) -> (i32, i32) {
    %c0_i32 = arith.constant 0 : i32
    %c0_i32_0 = arith.constant 0 : i32
    %c0_i32_1 = arith.constant 0 : i32
    return %c0_i32, %c0_i32_0 : i32, i32
  }
  func.func @transform_3(%arg0: i32) -> (i32, i32) {
    %c0_i32 = arith.constant 0 : i32
    %c0_i32_0 = arith.constant 0 : i32
    %c0_i32_1 = arith.constant 0 : i32
    return %c0_i32, %c0_i32_0 : i32, i32
  }
  func.func @transform_4(%arg0: i32) -> (i32, i32) {
    %c0_i32 = arith.constant 0 : i32
    %c0_i32_0 = arith.constant 0 : i32
    %c0_i32_1 = arith.constant 0 : i32
    return %c0_i32, %c0_i32_0 : i32, i32
  }
  func.func @transform_5(%arg0: i32) -> (i32, i32) {
    %c0_i32 = arith.constant 0 : i32
    %c0_i32_0 = arith.constant 0 : i32
    return %c0_i32, %arg0 : i32, i32
  }
}

</mosaic_0001>

<bundles_post_ra>
// kernel: mlp_net_forward.1
= control target key start
LH: loop header
LB: loop body
LE: loop exit
PB: predicated region body
PF: predicated region fallthrough
CT: control target
= control target key end

     0   :  { %s1754_s1 = inlined_call_operand.vmem [shape: bf16[128,128], index: 1, kind: input, shape index: {}]   ;;  %s1755_s0 = inlined_call_operand.vmem [shape: bf16[512,128], index: 0, kind: input, shape index: {}]   ;;  %s1756_s3 = inlined_call_operand.vmem [shape: f32[8,128], index: 3, kind: input, shape index: {}]   ;;  %s1757_s2 = inlined_call_operand.vmem [shape: f32[1,128], index: 2, kind: input, shape index: {}]   ;;  %s1758_s4 = inlined_call_operand.<no memory space> [shape: f32[1,1], index: 4, kind: input, shape index: {}]   ;;  %s1759_s5 = inlined_call_operand.vmem [shape: f32[1,512], index: 5, kind: output, shape index: {}]  }
   0x1   :  { %v1311_v0 = vld [vmem:[%s1754_s1] sm:$0xff]   ;;  %v1312_v1 = vld [vmem:[%s1754_s1 + $0x8] sm:$0xff]   ;;  %v1313_v2 = vld [vmem:[%s1754_s1 + $0x10] sm:$0xff]  }
   0x2   :  { %1166 = vmatprep.subr.bf16.mxu0 %v1311_v0  ;;  %v1314_v3 = vld [vmem:[%s1754_s1 + $0x18] sm:$0xff]   ;;  %v1319_v4 = vld [vmem:[%s1755_s0] sm:$0xff]   ;;  %v1316_v6 = vld [vmem:[%s1754_s1 + $0x28] sm:$0xff]  }
   0x3   :  { %1167 = vmatpush3.bf16.msra.mxu0 %v1311_v0  ;;  %1182 = vmatprep.mubr.bf16.mxu0 %v1319_v4  ;;  %v1315_v5 = vld [vmem:[%s1754_s1 + $0x20] sm:$0xff]   ;;  %v1317_v7 = vld [vmem:[%s1754_s1 + $0x30] sm:$0xff]   ;;  %v1318_v8 = vld [vmem:[%s1754_s1 + $0x38] sm:$0xff]  }
   0x4   :  { %1168 = vmatprep.subr.bf16.mxu0 %v1312_v1  ;;  %v1320_v9 = vld [vmem:[%s1755_s0 + $0x8] sm:$0xff]   ;;  %v1321_v10 = vld [vmem:[%s1755_s0 + $0x10] sm:$0xff]   ;;  %v1322_v11 = vld [vmem:[%s1755_s0 + $0x18] sm:$0xff]  }
   0x5   :  { %v1323_v12 = vld [vmem:[%s1755_s0 + $0x20] sm:$0xff]   ;;  %v1324_v13 = vld [vmem:[%s1755_s0 + $0x28] sm:$0xff]   ;;  %v1325_v14 = vld [vmem:[%s1755_s0 + $0x30] sm:$0xff]  }
   0x6   :  { %v1326_v15 = vld [vmem:[%s1755_s0 + $0x38] sm:$0xff]   ;;  %v1327_v16 = vld [vmem:[%s1755_s0 + $0x40] sm:$0xff]   ;;  %v1328_v17 = vld [vmem:[%s1755_s0 + $0x48] sm:$0xff]  }
   0x7   :  { %1169 = vmatpush3.bf16.msra.mxu0 %v1312_v1  ;;  %v1329_v18 = vld [vmem:[%s1755_s0 + $0x50] sm:$0xff]   ;;  %v1330_v19 = vld [vmem:[%s1755_s0 + $0x58] sm:$0xff]   ;;  %v1331_v20 = vld [vmem:[%s1755_s0 + $0x60] sm:$0xff]  }
   0x8   :  { %1170 = vmatprep.subr.bf16.mxu0 %v1313_v2  ;;  %v1332_v21 = vld [vmem:[%s1755_s0 + $0x68] sm:$0xff]   ;;  %v1333_v22 = vld [vmem:[%s1755_s0 + $0x70] sm:$0xff]   ;;  %v1334_v23 = vld [vmem:[%s1755_s0 + $0x78] sm:$0xff]  }
   0x9   :  { %v1335_v24 = vld [vmem:[%s1755_s0 + $0x80] sm:$0xff]   ;;  %v1336_v25 = vld [vmem:[%s1755_s0 + $0x88] sm:$0xff]   ;;  %v1337_v26 = vld [vmem:[%s1755_s0 + $0x90] sm:$0xff]  }
   0xa   :  { %v1338_v27 = vld [vmem:[%s1755_s0 + $0x98] sm:$0xff]   ;;  %v1339_v28 = vld [vmem:[%s1755_s0 + $0xa0] sm:$0xff]   ;;  %v1340_v29 = vld [vmem:[%s1755_s0 + $0xa8] sm:$0xff]  }
   0xb   :  { %1171 = vmatpush3.bf16.msra.mxu0 %v1313_v2  ;;  %v1341_v30 = vld [vmem:[%s1755_s0 + $0xb0] sm:$0xff]   ;;  %v1342_v31 = vld [vmem:[%s1755_s0 + $0xb8] sm:$0xff]   ;;  %v1343_v32 = vld [vmem:[%s1755_s0 + $0xc0] sm:$0xff]  }
   0xc   :  { %1172 = vmatprep.subr.bf16.mxu0 %v1314_v3  ;;  %v1344_v33 = vld [vmem:[%s1755_s0 + $0xc8] sm:$0xff]   ;;  %v1345_v34 = vld [vmem:[%s1755_s0 + $0xd0] sm:$0xff]   ;;  %v1346_v35 = vld [vmem:[%s1755_s0 + $0xd8] sm:$0xff]  }
   0xd   :  { %v1347_v36 = vld [vmem:[%s1755_s0 + $0xe0] sm:$0xff]   ;;  %v1348_v37 = vld [vmem:[%s1755_s0 + $0xe8] sm:$0xff]   ;;  %v1349_v38 = vld [vmem:[%s1755_s0 + $0xf0] sm:$0xff]  }
   0xe   :  { %v1350_v39 = vld [vmem:[%s1755_s0 + $0xf8] sm:$0xff]   ;;  %v1505_v40 = vld [vmem:[%s1756_s3] sm:$0xff] }
   0xf   :  { %1173 = vmatpush3.bf16.msra.mxu0 %v1314_v3  ;;  %1130 = vmatprep.mubr.f32.mxu1 %v1505_v40  ;;  %v1511_v41 = vld [vmem:[%s1757_s2] ss:$0 sm:$0xff] }
  0x10   :  { %1174 = vmatprep.subr.bf16.mxu0 %v1315_v5 }
  0x13   :  { %1175 = vmatpush3.bf16.msra.mxu0 %v1315_v5 }
  0x14   :  { %1176 = vmatprep.subr.bf16.mxu0 %v1316_v6 }
  0x17   :  { %1177 = vmatpush3.bf16.msra.mxu0 %v1316_v6 }
  0x18   :  { %1178 = vmatprep.subr.bf16.mxu0 %v1317_v7 }
  0x1b   :  { %1179 = vmatpush3.bf16.msra.mxu0 %v1317_v7 }
  0x1c   :  { %1180 = vmatprep.subr.bf16.mxu0 %v1318_v8 }
  0x1f   :  { %1181 = vmatpush3.bf16.msra.mxu0 %v1318_v8 }
  0x22   :  { %1183 = vmatmul.mubr.bf16.vlgmr.msra.gmra.mrb[0].mxu0 %v1320_v9 }
  0x23   :  { %1186 = vmatprep.mubr.bf16.mxu0 %v1321_v10 }
  0x2a   :  { %1187 = vmatmul.mubr.bf16.gmra.mrb[4].mxu0 %v1322_v11 }
  0x2b   :  { %1190 = vmatprep.mubr.bf16.mxu0 %v1323_v12 }
  0x32   :  { %1191 = vmatmul.mubr.bf16.gmra.mrb[8].mxu0 %v1324_v13 }
  0x33   :  { %1194 = vmatprep.mubr.bf16.mxu0 %v1325_v14 }
  0x3a   :  { %1195 = vmatmul.mubr.bf16.gmra.mrb[12].mxu0 %v1326_v15 }
  0x3b   :  { %1198 = vmatprep.mubr.bf16.mxu0 %v1327_v16 }
  0x42   :  { %1199 = vmatmul.mubr.bf16.gmra.mrb[16].mxu0 %v1328_v17 }
  0x43   :  { %1202 = vmatprep.mubr.bf16.mxu0 %v1329_v18 }
  0x4a   :  { %1203 = vmatmul.mubr.bf16.gmra.mrb[20].mxu0 %v1330_v19 }
  0x4b   :  { %1206 = vmatprep.mubr.bf16.mxu0 %v1331_v20 }
  0x52   :  { %1207 = vmatmul.mubr.bf16.gmra.mrb[24].mxu0 %v1332_v21 }
  0x53   :  { %1210 = vmatprep.mubr.bf16.mxu0 %v1333_v22 }
  0x5a   :  { %1211 = vmatmul.mubr.bf16.gmra.mrb[28].mxu0 %v1334_v23 }
  0x5b   :  { %1214 = vmatprep.mubr.bf16.mxu0 %v1335_v24 }
  0x62   :  { %1215 = vmatmul.mubr.bf16.gmra.mrb[32].mxu0 %v1336_v25 }
  0x63   :  { %1218 = vmatprep.mubr.bf16.mxu0 %v1337_v26 }
  0x6a   :  { %1219 = vmatmul.mubr.bf16.gmra.mrb[36].mxu0 %v1338_v27 }
  0x6b   :  { %1222 = vmatprep.mubr.bf16.mxu0 %v1339_v28 }
  0x72   :  { %1223 = vmatmul.mubr.bf16.gmra.mrb[40].mxu0 %v1340_v29 }
  0x73   :  { %1226 = vmatprep.mubr.bf16.mxu0 %v1341_v30 }
  0x7a   :  { %1227 = vmatmul.mubr.bf16.gmra.mrb[44].mxu0 %v1342_v31 }
  0x7b   :  { %1230 = vmatprep.mubr.bf16.mxu0 %v1343_v32 }
  0x82   :  { %1231 = vmatmul.mubr.bf16.gmra.mrb[48].mxu0 %v1344_v33 }
  0x83   :  { %1234 = vmatprep.mubr.bf16.mxu0 %v1345_v34 }
  0x8a   :  { %1235 = vmatmul.mubr.bf16.gmra.mrb[52].mxu0 %v1346_v35 }
  0x8b   :  { %1238 = vmatprep.mubr.bf16.mxu0 %v1347_v36 }
  0x92   :  { %1239 = vmatmul.mubr.bf16.gmra.mrb[56].mxu0 %v1348_v37 }
  0x93   :  { %1242 = vmatprep.mubr.bf16.mxu0 %v1349_v38 }
  0x9a   :  { %1243 = vmatmul.mubr.bf16.gmra.mrb[60].mxu0 %v1350_v39 }
  0xf5   :  { %v1184_v42 = vpop.f32.mrb[0].mxu0 }
  0xf6   :  { %v392_v43 = vadd.f32 %v1184_v42, %v1511_v41  ;;  %v383_v44 = vpop.f32.mrb[1].mxu0 }
  0xf7   :  { %v384_v45 = vadd.f32 %v1511_v41, %v383_v44  ;;  %v1185_v46 = vpop.f32.mrb[2].mxu0 }
  0xf8   :  { %v704_v47 = vmul.f32 0.01, %v392_v43  ;;  %v395_v48 = vadd.f32 %v1185_v46, %v1511_v41  ;;  %v386_v49 = vpop.f32.mrb[3].mxu0  ;;  %vm640_vm0 = vcmp.ge.f32.partialorder %v392_v43, 0.0 }
  0xf9   :  { %v702_v50 = vmul.f32 0.01, %v384_v45  ;;  %v387_v51 = vadd.f32 %v1511_v41, %v386_v49  ;;  %vm638_vm2 = vcmp.ge.f32.partialorder %v384_v45, 0.0 }
  0xfa   :  { %vm641_vm1 = vcmp.ge.f32.partialorder %v395_v48, 0.0  ;;  %v705_v52 = vmul.f32 0.01, %v395_v48  ;;  %v1517_v54 = vsel %vm640_vm0, %v392_v43, %v704_v47 }
  0xfb   :  { %v703_v53 = vmul.f32 0.01, %v387_v51  ;;  %vm639_vm3 = vcmp.ge.f32.partialorder %v387_v51, 0.0  ;;  %v1521_v57 = vsel %vm638_vm2, %v384_v45, %v702_v50 }
  0xfc   :  { %v1519_v55 = vsel %vm641_vm1, %v395_v48, %v705_v52 }
  0xfd   :  { %v1188_v56 = vpop.f32.mrb[4].mxu0  ;;  %v1523_v58 = vsel %vm639_vm3, %v387_v51, %v703_v53  ;;  %v1252_v59 = vpack.c.bf16 %v1519_v55, %v1517_v54 }
  0xfe   :  { %v408_v60 = vadd.f32 %v1188_v56, %v1511_v41  ;;  %v399_v61 = vpop.f32.mrb[5].mxu0  ;;  %v1248_v62 = vpack.c.bf16 %v1523_v58, %v1521_v57 }
  0xff   :  { %v400_v63 = vadd.f32 %v1511_v41, %v399_v61  ;;  %v1189_v0 = vpop.f32.mrb[6].mxu0 }
 0x100   :  { %v708_v1 = vmul.f32 0.01, %v408_v60  ;;  %v411_v2 = vadd.f32 %v1189_v0, %v1511_v41  ;;  %v402_v3 = vpop.f32.mrb[7].mxu0  ;;  %vm644_vm4 = vcmp.ge.f32.partialorder %v408_v60, 0.0 }
 0x101   :  { %v706_v4 = vmul.f32 0.01, %v400_v63  ;;  %v403_v5 = vadd.f32 %v1511_v41, %v402_v3  ;;  %vm642_vm5 = vcmp.ge.f32.partialorder %v400_v63, 0.0 }
 0x102   :  { %vm645_vm6 = vcmp.ge.f32.partialorder %v411_v2, 0.0  ;;  %v709_v6 = vmul.f32 0.01, %v411_v2  ;;  %v1533_v8 = vsel %vm644_vm4, %v408_v60, %v708_v1 }
 0x103   :  { %vm643_vm7 = vcmp.ge.f32.partialorder %v403_v5, 0.0  ;;  %v707_v7 = vmul.f32 0.01, %v403_v5  ;;  %v1537_v11 = vsel %vm642_vm5, %v400_v63, %v706_v4 }
 0x104   :  { %v1535_v9 = vsel %vm645_vm6, %v411_v2, %v709_v6 }
 0x105   :  { %v1192_v10 = vpop.f32.mrb[8].mxu0  ;;  %v1539_v12 = vsel %vm643_vm7, %v403_v5, %v707_v7  ;;  %v1260_v13 = vpack.c.bf16 %v1535_v9, %v1533_v8 }
 0x106   :  { %v424_v14 = vadd.f32 %v1192_v10, %v1511_v41  ;;  %v415_v15 = vpop.f32.mrb[9].mxu0  ;;  %v1256_v16 = vpack.c.bf16 %v1539_v12, %v1537_v11 }
 0x107   :  { %v416_v17 = vadd.f32 %v1511_v41, %v415_v15  ;;  %v1193_v18 = vpop.f32.mrb[10].mxu0 }
 0x108   :  { %v712_v19 = vmul.f32 0.01, %v424_v14  ;;  %v427_v20 = vadd.f32 %v1193_v18, %v1511_v41  ;;  %v418_v21 = vpop.f32.mrb[11].mxu0  ;;  %vm648_vm8 = vcmp.ge.f32.partialorder %v424_v14, 0.0 }
 0x109   :  { %v710_v22 = vmul.f32 0.01, %v416_v17  ;;  %v419_v23 = vadd.f32 %v1511_v41, %v418_v21  ;;  %vm646_vm9 = vcmp.ge.f32.partialorder %v416_v17, 0.0 }
 0x10a   :  { %vm649_vm10 = vcmp.ge.f32.partialorder %v427_v20, 0.0  ;;  %v713_v24 = vmul.f32 0.01, %v427_v20  ;;  %v1549_v26 = vsel %vm648_vm8, %v424_v14, %v712_v19 }
 0x10b   :  { %vm647_vm11 = vcmp.ge.f32.partialorder %v419_v23, 0.0  ;;  %v711_v25 = vmul.f32 0.01, %v419_v23  ;;  %v1553_v29 = vsel %vm646_vm9, %v416_v17, %v710_v22 }
 0x10c   :  { %v1551_v27 = vsel %vm649_vm10, %v427_v20, %v713_v24 }
 0x10d   :  { %v1196_v28 = vpop.f32.mrb[12].mxu0  ;;  %v1555_v30 = vsel %vm647_vm11, %v419_v23, %v711_v25  ;;  %v1268_v31 = vpack.c.bf16 %v1551_v27, %v1549_v26 }
 0x10e   :  { %v440_v32 = vadd.f32 %v1196_v28, %v1511_v41  ;;  %v431_v33 = vpop.f32.mrb[13].mxu0  ;;  %v1264_v34 = vpack.c.bf16 %v1555_v30, %v1553_v29 }
 0x10f   :  { %v432_v35 = vadd.f32 %v1511_v41, %v431_v33  ;;  %v1197_v36 = vpop.f32.mrb[14].mxu0 }
 0x110   :  { %v716_v37 = vmul.f32 0.01, %v440_v32  ;;  %v443_v38 = vadd.f32 %v1197_v36, %v1511_v41  ;;  %v434_v39 = vpop.f32.mrb[15].mxu0  ;;  %vm652_vm12 = vcmp.ge.f32.partialorder %v440_v32, 0.0 }
 0x111   :  { %v714_v42 = vmul.f32 0.01, %v432_v35  ;;  %v435_v43 = vadd.f32 %v1511_v41, %v434_v39  ;;  %vm650_vm13 = vcmp.ge.f32.partialorder %v432_v35, 0.0 }
 0x112   :  { %vm653_vm14 = vcmp.ge.f32.partialorder %v443_v38, 0.0  ;;  %v717_v44 = vmul.f32 0.01, %v443_v38  ;;  %v1565_v46 = vsel %vm652_vm12, %v440_v32, %v716_v37 }
 0x113   :  { %vm651_vm15 = vcmp.ge.f32.partialorder %v435_v43, 0.0  ;;  %v715_v45 = vmul.f32 0.01, %v435_v43  ;;  %v1569_v49 = vsel %vm650_vm13, %v432_v35, %v714_v42 }
 0x114   :  { %v1567_v47 = vsel %vm653_vm14, %v443_v38, %v717_v44 }
 0x115   :  { %v1200_v48 = vpop.f32.mrb[16].mxu0  ;;  %v1571_v50 = vsel %vm651_vm15, %v435_v43, %v715_v45  ;;  %v1276_v51 = vpack.c.bf16 %v1567_v47, %v1565_v46 }
 0x116   :  { %v456_v52 = vadd.f32 %v1200_v48, %v1511_v41  ;;  %v447_v53 = vpop.f32.mrb[17].mxu0  ;;  %v1272_v56 = vpack.c.bf16 %v1571_v50, %v1569_v49 }
 0x117   :  { %v448_v60 = vadd.f32 %v1511_v41, %v447_v53  ;;  %v1201_v61 = vpop.f32.mrb[18].mxu0 }
 0x118   :  { %v720_v63 = vmul.f32 0.01, %v456_v52  ;;  %v459_v0 = vadd.f32 %v1201_v61, %v1511_v41  ;;  %v450_v1 = vpop.f32.mrb[19].mxu0  ;;  %vm656_vm0 = vcmp.ge.f32.partialorder %v456_v52, 0.0 }
 0x119   :  { %v718_v2 = vmul.f32 0.01, %v448_v60  ;;  %v451_v3 = vadd.f32 %v1511_v41, %v450_v1  ;;  %vm654_vm2 = vcmp.ge.f32.partialorder %v448_v60, 0.0 }
 0x11a   :  { %vm657_vm1 = vcmp.ge.f32.partialorder %v459_v0, 0.0  ;;  %v721_v4 = vmul.f32 0.01, %v459_v0  ;;  %v784_v6 = vsel %vm656_vm0, %v456_v52, %v720_v63 }
 0x11b   :  { %v719_v5 = vmul.f32 0.01, %v451_v3  ;;  %vm655_vm3 = vcmp.ge.f32.partialorder %v451_v3, 0.0  ;;  %v782_v14 = vsel %vm654_vm2, %v448_v60, %v718_v2 }
 0x11c   :  { %v785_v7 = vsel %vm657_vm1, %v459_v0, %v721_v4 }
 0x11d   :  { %v1204_v10 = vpop.f32.mrb[20].mxu0  ;;  %v783_v15 = vsel %vm655_vm3, %v451_v3, %v719_v5  ;;  %v1250_v17 = vpack.c.bf16 %v785_v7, %v784_v6 }
 0x11e   :  { %v472_v18 = vadd.f32 %v1204_v10, %v1511_v41  ;;  %v463_v19 = vpop.f32.mrb[21].mxu0  ;;  %v1246_v20 = vpack.c.bf16 %v783_v15, %v782_v14 }
 0x11f   :  { %v464_v21 = vadd.f32 %v1511_v41, %v463_v19  ;;  %v1205_v22 = vpop.f32.mrb[22].mxu0 }
 0x120   :  { %v724_v23 = vmul.f32 0.01, %v472_v18  ;;  %v475_v24 = vadd.f32 %v1205_v22, %v1511_v41  ;;  %v466_v25 = vpop.f32.mrb[23].mxu0  ;;  %1247 = vmatprep.subr.bf16.mxu1 %v1246_v20  ;;  %vm660_vm4 = vcmp.ge.f32.partialorder %v472_v18, 0.0 }
 0x121   :  { %v722_v28 = vmul.f32 0.01, %v464_v21  ;;  %v467_v32 = vadd.f32 %v1511_v41, %v466_v25  ;;  %1249 = vmatpush3.bf16.xpose.msra.mxu1 %v1248_v62  ;;  %vm658_vm5 = vcmp.ge.f32.partialorder %v464_v21, 0.0 }
 0x122   :  { %vm661_vm6 = vcmp.ge.f32.partialorder %v475_v24, 0.0  ;;  %v725_v33 = vmul.f32 0.01, %v475_v24  ;;  %1251 = vmatprep.subr.bf16.mxu1 %v1250_v17  ;;  %v788_v36 = vsel %vm660_vm4, %v472_v18, %v724_v23 }
 0x123   :  { %vm659_vm7 = vcmp.ge.f32.partialorder %v467_v32, 0.0  ;;  %v723_v35 = vmul.f32 0.01, %v467_v32  ;;  %v786_v39 = vsel %vm658_vm5, %v464_v21, %v722_v28 }
 0x124   :  { %v789_v37 = vsel %vm661_vm6, %v475_v24, %v725_v33 }
 0x125   :  { %v1208_v38 = vpop.f32.mrb[24].mxu0  ;;  %v787_v42 = vsel %vm659_vm7, %v467_v32, %v723_v35  ;;  %v1258_v43 = vpack.c.bf16 %v789_v37, %v788_v36 }
 0x126   :  { %v488_v44 = vadd.f32 %v1208_v38, %v1511_v41  ;;  %v479_v45 = vpop.f32.mrb[25].mxu0  ;;  %v1254_v48 = vpack.c.bf16 %v787_v42, %v786_v39 }
 0x127   :  { %v480_v52 = vadd.f32 %v1511_v41, %v479_v45  ;;  %v1209_v57 = vpop.f32.mrb[26].mxu0 }
 0x128   :  { %v728_v58 = vmul.f32 0.01, %v488_v44  ;;  %v491_v62 = vadd.f32 %v1209_v57, %v1511_v41  ;;  %v482_v53 = vpop.f32.mrb[27].mxu0  ;;  %vm664_vm8 = vcmp.ge.f32.partialorder %v488_v44, 0.0 }
 0x129   :  { %v726_v60 = vmul.f32 0.01, %v480_v52  ;;  %v483_v61 = vadd.f32 %v1511_v41, %v482_v53  ;;  %1253 = vmatpush3.bf16.xpose.msra.mxu1 %v1252_v59  ;;  %vm662_vm9 = vcmp.ge.f32.partialorder %v480_v52, 0.0 }
 0x12a   :  { %vm665_vm10 = vcmp.ge.f32.partialorder %v491_v62, 0.0  ;;  %v729_v63 = vmul.f32 0.01, %v491_v62  ;;  %1255 = vmatprep.subr.bf16.mxu1 %v1254_v48  ;;  %v1595_v1 = vsel %vm664_vm8, %v488_v44, %v728_v58 }
 0x12b   :  { %vm663_vm11 = vcmp.ge.f32.partialorder %v483_v61, 0.0  ;;  %v727_v0 = vmul.f32 0.01, %v483_v61  ;;  %v790_v4 = vsel %vm662_vm9, %v480_v52, %v726_v60 }
 0x12c   :  { %v1597_v2 = vsel %vm665_vm10, %v491_v62, %v729_v63 }
 0x12d   :  { %v1212_v3 = vpop.f32.mrb[28].mxu0  ;;  %v791_v5 = vsel %vm663_vm11, %v483_v61, %v727_v0  ;;  %v1266_v6 = vpack.c.bf16 %v1597_v2, %v1595_v1 }
 0x12e   :  { %v504_v7 = vadd.f32 %v1212_v3, %v1511_v41  ;;  %v495_v54 = vpop.f32.mrb[29].mxu0  ;;  %v1262_v55 = vpack.c.bf16 %v791_v5, %v790_v4 }
 0x12f   :  { %v496_v59 = vadd.f32 %v1511_v41, %v495_v54  ;;  %v1213_v10 = vpop.f32.mrb[30].mxu0 }
 0x130   :  { %v732_v14 = vmul.f32 0.01, %v504_v7  ;;  %v507_v15 = vadd.f32 %v1213_v10, %v1511_v41  ;;  %v498_v17 = vpop.f32.mrb[31].mxu0  ;;  %vm668_vm12 = vcmp.ge.f32.partialorder %v504_v7, 0.0 }
 0x131   :  { %v730_v18 = vmul.f32 0.01, %v496_v59  ;;  %v499_v19 = vadd.f32 %v1511_v41, %v498_v17  ;;  %1257 = vmatpush3.bf16.xpose.msra.mxu1 %v1256_v16  ;;  %vm666_vm13 = vcmp.ge.f32.partialorder %v496_v59, 0.0 }
 0x132   :  { %vm669_vm14 = vcmp.ge.f32.partialorder %v507_v15, 0.0  ;;  %v733_v20 = vmul.f32 0.01, %v507_v15  ;;  %1259 = vmatprep.subr.bf16.mxu1 %v1258_v43  ;;  %v1608_v22 = vsel %vm668_vm12, %v504_v7, %v732_v14 }
 0x133   :  { %vm667_vm15 = vcmp.ge.f32.partialorder %v499_v19, 0.0  ;;  %v731_v21 = vmul.f32 0.01, %v499_v19  ;;  %v1612_v25 = vsel %vm666_vm13, %v496_v59, %v730_v18 }
 0x134   :  { %v1610_v23 = vsel %vm669_vm14, %v507_v15, %v733_v20 }
 0x135   :  { %v1216_v24 = vpop.f32.mrb[32].mxu0  ;;  %v1614_v28 = vsel %vm667_vm15, %v499_v19, %v731_v21  ;;  %v1274_v32 = vpack.c.bf16 %v1610_v23, %v1608_v22 }
 0x136   :  { %v520_v11 = vadd.f32 %v1216_v24, %v1511_v41  ;;  %v511_v12 = vpop.f32.mrb[33].mxu0  ;;  %v1270_v16 = vpack.c.bf16 %v1614_v28, %v1612_v25 }
 0x137   :  { %v512_v33 = vadd.f32 %v1511_v41, %v511_v12  ;;  %v1217_v35 = vpop.f32.mrb[34].mxu0 }
 0x138   :  { %v736_v36 = vmul.f32 0.01, %v520_v11  ;;  %v523_v37 = vadd.f32 %v1217_v35, %v1511_v41  ;;  %v514_v38 = vpop.f32.mrb[35].mxu0  ;;  %vm672_vm0 = vcmp.ge.f32.partialorder %v520_v11, 0.0 }
 0x139   :  { %v734_v39 = vmul.f32 0.01, %v512_v33  ;;  %v515_v42 = vadd.f32 %v1511_v41, %v514_v38  ;;  %1261 = vmatpush3.bf16.xpose.msra.mxu1 %v1260_v13  ;;  %vm670_vm1 = vcmp.ge.f32.partialorder %v512_v33, 0.0 }
 0x13a   :  { %vm673_vm2 = vcmp.ge.f32.partialorder %v523_v37, 0.0  ;;  %v737_v43 = vmul.f32 0.01, %v523_v37  ;;  %1263 = vmatprep.subr.bf16.mxu1 %v1262_v55  ;;  %v1627_v45 = vsel %vm672_vm0, %v520_v11, %v736_v36 }
 0x13b   :  { %vm671_vm3 = vcmp.ge.f32.partialorder %v515_v42, 0.0  ;;  %v735_v44 = vmul.f32 0.01, %v515_v42  ;;  %v1631_v52 = vsel %vm670_vm1, %v512_v33, %v734_v39 }
 0x13c   :  { %v1629_v48 = vsel %vm673_vm2, %v523_v37, %v737_v43 }
 0x13d   :  { %v1284_v57 = vpack.c.bf16 %v1629_v48, %v1627_v45  ;;  %v1635_v58 = vsel %vm671_vm3, %v515_v42, %v735_v44  ;;  %v1220_v62 = vpop.f32.mrb[36].mxu0 }
 0x13e   :  { %v1280_v8 = vpack.c.bf16 %v1635_v58, %v1631_v52  ;;  %v536_v9 = vadd.f32 %v1220_v62, %v1511_v41  ;;  %v527_v13 = vpop.f32.mrb[37].mxu0 }
 0x13f   :  { %v528_v53 = vadd.f32 %v1511_v41, %v527_v13  ;;  %v1221_v60 = vpop.f32.mrb[38].mxu0 }
 0x140   :  { %v740_v61 = vmul.f32 0.01, %v536_v9  ;;  %v539_v63 = vadd.f32 %v1221_v60, %v1511_v41  ;;  %v530_v0 = vpop.f32.mrb[39].mxu0  ;;  %vm676_vm4 = vcmp.ge.f32.partialorder %v536_v9, 0.0 }
 0x141   :  { %v738_v3 = vmul.f32 0.01, %v528_v53  ;;  %v531_v4 = vadd.f32 %v1511_v41, %v530_v0  ;;  %1265 = vmatpush3.bf16.xpose.msra.mxu1 %v1264_v34  ;;  %vm674_vm5 = vcmp.ge.f32.partialorder %v528_v53, 0.0 }
 0x142   :  { %vm677_vm6 = vcmp.ge.f32.partialorder %v539_v63, 0.0  ;;  %v741_v5 = vmul.f32 0.01, %v539_v63  ;;  %1267 = vmatprep.subr.bf16.mxu1 %v1266_v6  ;;  %v1649_v54 = vsel %vm676_vm4, %v536_v9, %v740_v61 }
 0x143   :  { %vm675_vm7 = vcmp.ge.f32.partialorder %v531_v4, 0.0  ;;  %v739_v7 = vmul.f32 0.01, %v531_v4  ;;  %v1653_v59 = vsel %vm674_vm5, %v528_v53, %v738_v3 }
 0x144   :  { %v1651_v55 = vsel %vm677_vm6, %v539_v63, %v741_v5 }
 0x145   :  { %v1292_v10 = vpack.c.bf16 %v1651_v55, %v1649_v54  ;;  %v1657_v29 = vsel %vm675_vm7, %v531_v4, %v739_v7  ;;  %v1224_v30 = vpop.f32.mrb[40].mxu0 }
 0x146   :  { %v1288_v34 = vpack.c.bf16 %v1657_v29, %v1653_v59  ;;  %v552_v1 = vadd.f32 %v1224_v30, %v1511_v41  ;;  %v543_v2 = vpop.f32.mrb[41].mxu0 }
 0x147   :  { %v544_v6 = vadd.f32 %v1511_v41, %v543_v2  ;;  %v1225_v14 = vpop.f32.mrb[42].mxu0 }
 0x148   :  { %v744_v15 = vmul.f32 0.01, %v552_v1  ;;  %v555_v17 = vadd.f32 %v1225_v14, %v1511_v41  ;;  %v546_v18 = vpop.f32.mrb[43].mxu0  ;;  %vm680_vm8 = vcmp.ge.f32.partialorder %v552_v1, 0.0 }
 0x149   :  { %v742_v19 = vmul.f32 0.01, %v544_v6  ;;  %v547_v20 = vadd.f32 %v1511_v41, %v546_v18  ;;  %1269 = vmatpush3.bf16.xpose.msra.mxu1 %v1268_v31  ;;  %vm678_vm9 = vcmp.ge.f32.partialorder %v544_v6, 0.0 }
 0x14a   :  { %vm681_vm10 = vcmp.ge.f32.partialorder %v555_v17, 0.0  ;;  %v745_v21 = vmul.f32 0.01, %v555_v17  ;;  %1271 = vmatprep.subr.bf16.mxu1 %v1270_v16  ;;  %v1668_v25 = vsel %vm680_vm8, %v552_v1, %v744_v15 }
 0x14b   :  { %vm679_vm11 = vcmp.ge.f32.partialorder %v547_v20, 0.0  ;;  %v743_v24 = vmul.f32 0.01, %v547_v20  ;;  %v1672_v11 = vsel %vm678_vm9, %v544_v6, %v742_v19 }
 0x14c   :  { %v1670_v28 = vsel %vm681_vm10, %v555_v17, %v745_v21 }
 0x14d   :  { %v1300_v12 = vpack.c.bf16 %v1670_v28, %v1668_v25  ;;  %v1676_v33 = vsel %vm679_vm11, %v547_v20, %v743_v24  ;;  %v1228_v35 = vpop.f32.mrb[44].mxu0  ;;  %v988_v28 = vlaneseq }
 0x14e   :  { %v1296_v26 = vpack.c.bf16 %v1676_v33, %v1672_v11  ;;  %v568_v27 = vadd.f32 %v1228_v35, %v1511_v41  ;;  %v559_v31 = vpop.f32.mrb[45].mxu0 }
 0x14f   :  { %v560_v16 = vadd.f32 %v1511_v41, %v559_v31  ;;  %v1229_v36 = vpop.f32.mrb[46].mxu0 }
 0x150   :  { %v748_v37 = vmul.f32 0.01, %v568_v27  ;;  %v571_v38 = vadd.f32 %v1229_v36, %v1511_v41  ;;  %v562_v39 = vpop.f32.mrb[47].mxu0  ;;  %vm684_vm12 = vcmp.ge.f32.partialorder %v568_v27, 0.0 }
 0x151   :  { %v746_v42 = vmul.f32 0.01, %v560_v16  ;;  %v563_v43 = vadd.f32 %v1511_v41, %v562_v39  ;;  %1273 = vmatpush3.bf16.xpose.msra.mxu1 %v1272_v56  ;;  %vm682_vm13 = vcmp.ge.f32.partialorder %v560_v16, 0.0 }
 0x152   :  { %vm685_vm14 = vcmp.ge.f32.partialorder %v571_v38, 0.0  ;;  %v749_v44 = vmul.f32 0.01, %v571_v38  ;;  %1275 = vmatprep.subr.bf16.mxu1 %v1274_v32  ;;  %v1690_v9 = vsel %vm684_vm12, %v568_v27, %v748_v37 }
 0x153   :  { %vm683_vm15 = vcmp.ge.f32.partialorder %v563_v43, 0.0  ;;  %v747_v62 = vmul.f32 0.01, %v563_v43  ;;  %v1694_v53 = vsel %vm682_vm13, %v560_v16, %v746_v42 }
 0x154   :  { %v1692_v13 = vsel %vm685_vm14, %v571_v38, %v749_v44 }
 0x155   :  { %v1308_v60 = vpack.c.bf16 %v1692_v13, %v1690_v9  ;;  %v1698_v49 = vsel %vm683_vm15, %v563_v43, %v747_v62  ;;  %v1232_v50 = vpop.f32.mrb[48].mxu0 }
 0x156   :  { %v1304_v56 = vpack.c.bf16 %v1698_v49, %v1694_v53  ;;  %v584_v22 = vadd.f32 %v1232_v50, %v1511_v41  ;;  %v575_v23 = vpop.f32.mrb[49].mxu0 }
 0x157   :  { %v576_v32 = vadd.f32 %v1511_v41, %v575_v23  ;;  %v1233_v61 = vpop.f32.mrb[50].mxu0 }
 0x158   :  { %v752_v63 = vmul.f32 0.01, %v584_v22  ;;  %v587_v0 = vadd.f32 %v1233_v61, %v1511_v41  ;;  %v578_v3 = vpop.f32.mrb[51].mxu0  ;;  %vm688_vm0 = vcmp.ge.f32.partialorder %v584_v22, 0.0 }
 0x159   :  { %v750_v4 = vmul.f32 0.01, %v576_v32  ;;  %v579_v5 = vadd.f32 %v1511_v41, %v578_v3  ;;  %1277 = vmatpush3.bf16.xpose.msra.mxu1 %v1276_v51  ;;  %vm686_vm1 = vcmp.ge.f32.partialorder %v576_v32, 0.0 }
 0x15a   :  { %vm689_vm2 = vcmp.ge.f32.partialorder %v587_v0, 0.0  ;;  %v753_v7 = vmul.f32 0.01, %v587_v0  ;;  %v816_v1 = vsel %vm688_vm0, %v584_v22, %v752_v63  ;;  %vm1010_vm0 = vcmp.lt.s32.totalorder %v988_v28, 512 }
 0x15b   :  { %vm687_vm3 = vcmp.ge.f32.partialorder %v579_v5, 0.0  ;;  %v751_v30 = vmul.f32 0.01, %v579_v5  ;;  %v814_v14 = vsel %vm686_vm1, %v576_v32, %v750_v4 }
 0x15c   :  { %v817_v2 = vsel %vm689_vm2, %v587_v0, %v753_v7 }
 0x15d   :  { %v1236_v6 = vpop.f32.mrb[52].mxu0  ;;  %v815_v15 = vsel %vm687_vm3, %v579_v5, %v751_v30  ;;  %v1282_v17 = vpack.c.bf16 %v817_v2, %v816_v1 }
 0x15e   :  { %v600_v18 = vadd.f32 %v1236_v6, %v1511_v41  ;;  %v1278_v19 = vpack.c.bf16 %v815_v15, %v814_v14  ;;  %v591_v20 = vpop.f32.mrb[53].mxu0 }
 0x15f   :  { %v592_v21 = vadd.f32 %v1511_v41, %v591_v20  ;;  %v1237_v24 = vpop.f32.mrb[54].mxu0 }
 0x160   :  { %vm692_vm4 = vcmp.ge.f32.partialorder %v600_v18, 0.0  ;;  %v756_v46 = vmul.f32 0.01, %v600_v18  ;;  %1131 = vmatmul.mubr.f32.vlgmr.msra.gmra.mrb[0].mxu1 %v1505_v40  ;;  %1279 = vmatprep.subr.bf16.mxu1 %v1278_v19  ;;  %v603_v47 = vadd.f32 %v1237_v24, %v1511_v41  ;;  %v594_v51 = vpop.f32.mrb[55].mxu0 }
 0x161   :  { %vm690_vm5 = vcmp.ge.f32.partialorder %v592_v21, 0.0  ;;  %v754_v35 = vmul.f32 0.01, %v592_v21  ;;  %1281 = vmatpush3.bf16.xpose.msra.mxu1 %v1280_v8  ;;  %v595_v27 = vadd.f32 %v1511_v41, %v594_v51  ;;  %1164 = vmatprep.mubr.f32.mxu1 %v1505_v40 }
 0x162   :  { %vm693_vm6 = vcmp.ge.f32.partialorder %v603_v47, 0.0  ;;  %v757_v31 = vmul.f32 0.01, %v603_v47  ;;  %1283 = vmatprep.subr.bf16.mxu1 %v1282_v17  ;;  %v820_v16 = vsel %vm692_vm4, %v600_v18, %v756_v46 }
 0x163   :  { %vm691_vm7 = vcmp.ge.f32.partialorder %v595_v27, 0.0  ;;  %v755_v36 = vmul.f32 0.01, %v595_v27  ;;  %v818_v37 = vsel %vm690_vm5, %v592_v21, %v754_v35 }
 0x164   :  { %v821_v38 = vsel %vm693_vm6, %v603_v47, %v757_v31 }
 0x165   :  { %v819_v39 = vsel %vm691_vm7, %v595_v27, %v755_v36  ;;  %v1240_v42 = vpop.f32.mrb[56].mxu0  ;;  %v1290_v43 = vpack.c.bf16 %v821_v38, %v820_v16 }
 0x166   :  { %v1286_v44 = vpack.c.bf16 %v819_v39, %v818_v37  ;;  %v616_v62 = vadd.f32 %v1240_v42, %v1511_v41  ;;  %v607_v52 = vpop.f32.mrb[57].mxu0 }
 0x167   :  { %v608_v58 = vadd.f32 %v1511_v41, %v607_v52  ;;  %v1241_v8 = vpop.f32.mrb[58].mxu0 }
 0x168   :  { %vm696_vm8 = vcmp.ge.f32.partialorder %v616_v62, 0.0  ;;  %v760_v50 = vmul.f32 0.01, %v616_v62  ;;  %v619_v22 = vadd.f32 %v1241_v8, %v1511_v41  ;;  %v610_v23 = vpop.f32.mrb[59].mxu0 }
 0x169   :  { %1285 = vmatpush3.bf16.xpose.msra.mxu1 %v1284_v57  ;;  %vm694_vm9 = vcmp.ge.f32.partialorder %v608_v58, 0.0  ;;  %v758_v32 = vmul.f32 0.01, %v608_v58  ;;  %v611_v61 = vadd.f32 %v1511_v41, %v610_v23 }
 0x16a   :  { %1287 = vmatprep.subr.bf16.mxu1 %v1286_v44  ;;  %vm697_vm10 = vcmp.ge.f32.partialorder %v619_v22, 0.0  ;;  %v761_v63 = vmul.f32 0.01, %v619_v22  ;;  %v824_v0 = vsel %vm696_vm8, %v616_v62, %v760_v50 }
 0x16b   :  { %vm695_vm11 = vcmp.ge.f32.partialorder %v611_v61, 0.0  ;;  %v759_v3 = vmul.f32 0.01, %v611_v61  ;;  %v822_v4 = vsel %vm694_vm9, %v608_v58, %v758_v32 }
 0x16c   :  { %v825_v5 = vsel %vm697_vm10, %v619_v22, %v761_v63 }
 0x16d   :  { %v823_v7 = vsel %vm695_vm11, %v611_v61, %v759_v3  ;;  %v1244_v30 = vpop.f32.mrb[60].mxu0  ;;  %v1298_v1 = vpack.c.bf16 %v825_v5, %v824_v0 }
 0x16e   :  { %v1294_v2 = vpack.c.bf16 %v823_v7, %v822_v4  ;;  %v632_v6 = vadd.f32 %v1244_v30, %v1511_v41  ;;  %v623_v45 = vpop.f32.mrb[61].mxu0 }
 0x16f   :  { %v624_v48 = vadd.f32 %v1511_v41, %v623_v45  ;;  %v1245_v57 = vpop.f32.mrb[62].mxu0 }
 0x170   :  { %vm700_vm12 = vcmp.ge.f32.partialorder %v632_v6, 0.0  ;;  %v764_v14 = vmul.f32 0.01, %v632_v6  ;;  %v635_v15 = vadd.f32 %v1245_v57, %v1511_v41  ;;  %v626_v17 = vpop.f32.mrb[63].mxu0 }
 0x171   :  { %1289 = vmatpush3.bf16.xpose.msra.mxu1 %v1288_v34  ;;  %vm698_vm13 = vcmp.ge.f32.partialorder %v624_v48, 0.0  ;;  %v762_v18 = vmul.f32 0.01, %v624_v48  ;;  %v627_v19 = vadd.f32 %v1511_v41, %v626_v17  ;;  %v974_v41 = vstv %s1758_s4 }
 0x172   :  { %1291 = vmatprep.subr.bf16.mxu1 %v1290_v43  ;;  %vm701_vm14 = vcmp.ge.f32.partialorder %v635_v15, 0.0  ;;  %v765_v20 = vmul.f32 0.01, %v635_v15  ;;  %v828_v21 = vsel %vm700_vm12, %v632_v6, %v764_v14  ;;  %v1351_v34 = vmov 1966171168  }
 0x173   :  { %vm699_vm15 = vcmp.ge.f32.partialorder %v627_v19, 0.0  ;;  %v763_v24 = vmul.f32 0.01, %v627_v19  ;;  %v826_v46 = vsel %vm698_vm13, %v624_v48, %v762_v18  ;;  %v986_v25 = vunpack.c.l.s4 %v1351_v34 }
 0x174   :  { %v829_v47 = vsel %vm701_vm14, %v635_v15, %v765_v20 }
 0x175   :  { %v827_v51 = vsel %vm699_vm15, %v627_v19, %v763_v24  ;;  %v1306_v35 = vpack.c.bf16 %v829_v47, %v828_v21  ;;  %v987_v11 = vunpack.c.0.s8 %v986_v25 }
 0x176   :  { %v1302_v27 = vpack.c.bf16 %v827_v51, %v826_v46 }
 0x179   :  { %1293 = vmatpush3.bf16.xpose.msra.mxu1 %v1292_v10 }
 0x17a   :  { %1295 = vmatprep.subr.bf16.mxu1 %v1294_v2 }
 0x181   :  { %1297 = vmatpush3.bf16.xpose.msra.mxu1 %v1296_v26 }
 0x182   :  { %1299 = vmatprep.subr.bf16.mxu1 %v1298_v1 }
 0x189   :  { %1301 = vmatpush3.bf16.xpose.msra.mxu1 %v1300_v12  ;;  %v989_v12 = vshrl.u32 %v988_v28, 7 }
 0x18a   :  { %1303 = vmatprep.subr.bf16.mxu1 %v1302_v27 }
 0x18b   :  { %v990_v13 = vsub.s32 %v987_v11, %v989_v12 }
 0x191   :  { %1305 = vmatpush3.bf16.xpose.msra.mxu1 %v1304_v56 }
 0x192   :  { %1307 = vmatprep.subr.bf16.mxu1 %v1306_v35 }
 0x199   :  { %1309 = vmatpush3.bf16.xpose.msra.mxu1 %v1308_v60 }
 0x1a0   :  { %1165 = vmatmul.mubr.f32.vlgmr.msra.gmra.mrb[2].mxu1 %v1505_v40 }
 0x233   :  { %v897_v54 = vpop.f32.mrb[0].mxu1 }
 0x234   :  { %v975_v55 = vadd.f32 %v974_v41, %v897_v54  ;;  %v899_v59 = vpop.f32.mrb[1].mxu1 }
 0x235   :  { %v976_v10 = vadd.f32 %v974_v41, %v899_v59 }
 0x237   :  { %v983_v29 = vcombine.low %v975_v55, %v976_v10 }
 0x239   :  { %v991_v60 = vrot.slane %v983_v29, %v990_v13 }
 0x273   :  { %v968_v33 = vpop.f32.mrb[2].mxu1 }
 0x274   :  { %v977_v26 = vadd.f32 %v974_v41, %v968_v33  ;;  %v970_v9 = vpop.f32.mrb[3].mxu1 }
 0x275   :  { %v978_v53 = vadd.f32 %v974_v41, %v970_v9 }
 0x277   :  { %v984_v40 = vcombine.low %v977_v26, %v978_v53 }
 0x279   :  { %v998_v49 = vrot.slane %v984_v40, %v990_v13 }
 0x27b   :  { %v999_v56 = vcombine.low %v991_v60, %v998_v49 }
 0x27d   :  { %v1006_v31 = vrot.slane %v999_v56, %v990_v13 }
 0x27f   :  { %1012 = vst.msk [vmem:[%s1759_s5] sm:$0xf] %vm1010_vm0, %v1006_v31 }

</bundles_post_ra>
